<compile_context>
chip_gen: v7x
topology: tpu7x:2x2x1
jax: 0.10.0
libtpu: 0.0.40
codegen_flags: <defaults>
</compile_context>

<pallas_src>
import math
from functools import partial

import jax
import jax.numpy as jnp
from jax.experimental import pallas as pl
from jax.experimental.pallas import tpu as pltpu


def _round_up(x, m):
    return ((x + m - 1) // m) * m


def _pad2d(x, rows, cols):
    r, c = x.shape
    if r == rows and c == cols:
        return x
    return jnp.pad(x, ((0, rows - r), (0, cols - c)))


def _phys_vmem_bytes():
    try:
        return pltpu.get_tpu_info().vmem_capacity_bytes
    except Exception:
        return 64 << 20  # conservative (v7x-sized) fallback


def _tile_footprint(tm, tk, f_in_pad, f_out_pad):
    """Approximate VMEM bytes for one pipelined grid step (double-buffered)."""
    b = 2 * tm * tk * 4                 # adj f32 tiles, double-buffered
    b += 2 * tk * f_in_pad * 4          # x tiles
    b += 2 * f_in_pad * f_out_pad * 4   # weight
    b += 2 * f_out_pad * 4              # bias row
    b += 2 * tm * f_out_pad * 4         # output tiles
    b += tm * f_out_pad * 4             # f32 accumulator scratch
    # in-kernel bf16 temporaries (adj/x/w casts + support)
    b += tm * tk * 2 + tk * f_in_pad * 2 + f_in_pad * f_out_pad * 2
    b += 2 * tk * f_out_pad * 2 + tm * f_out_pad * 2
    return b


def _pick_tiles(n, f_in_pad, f_out_pad):
    """Pick (tm, tk) first; the wrapper pads N up to these tile multiples."""
    phys = _phys_vmem_bytes()
    budget = (phys * 3) // 5            # leave room for compiler scratch
    # v5e/v6e (128 MiB VMEM) can take 2048-class tiles; v7x (64 MiB) stays 1024.
    pref = 2048 if phys >= (96 << 20) else 1024

    n128 = _round_up(n, 128)
    # Row (parallel) axis: keep >= 2 blocks when N allows it (v7x has 2 TCs),
    # by capping tm at ~half the padded extent.
    half = max(128, _round_up((n128 + 1) // 2, 128))
    tm = max(128, min(pref, half))
    tk = max(128, min(pref, n128))

    while _tile_footprint(tm, tk, f_in_pad, f_out_pad) > budget and tk > 128:
        tk -= 128
    while _tile_footprint(tm, tk, f_in_pad, f_out_pad) > budget and tm > 128:
        tm -= 128
    # TODO(synk): for extremely wide F_out (tm=tk=128 still over budget), add a
    # column-tiled fallback; typical GCN widths never hit this.
    return tm, tk


def _vmem_limit_bytes(tm, tk, f_in_pad, f_out_pad):
    phys = _phys_vmem_bytes()
    want = int(_tile_footprint(tm, tk, f_in_pad, f_out_pad) * 1.3) + (4 << 20)
    cap = (phys * 3) // 4               # never request all of VMEM
    return int(max(min(want, cap), 8 << 20))


def _make_gcn_kernel(with_bias):
    def kernel(*refs):
        if with_bias:
            adj_ref, x_ref, w_ref, bias_ref, o_ref, acc_ref = refs
        else:
            adj_ref, x_ref, w_ref, o_ref, acc_ref = refs

        k = pl.program_id(1)

        @pl.when(k == 0)
        def _():
            acc_ref[...] = jnp.zeros_like(acc_ref)

        # Recompute the k-slice of support = X @ W on the fly (F_in is small,
        # so this costs ~F_in/tm of the dominant matmul and keeps `support`
        # on-chip: no HBM round trip, no second kernel launch).
        support = jnp.dot(
            x_ref[...].astype(jnp.bfloat16),
            w_ref[...].astype(jnp.bfloat16),
            preferred_element_type=jnp.float32,
        )

        # Dominant adj @ support contribution; adj is cast bf16 in-kernel
        # (no wrapper-side extra pass over N^2), accumulation stays f32.
        acc_ref[...] += jnp.dot(
            adj_ref[...].astype(jnp.bfloat16),
            support.astype(jnp.bfloat16),
            preferred_element_type=jnp.float32,
        )

        @pl.when(k == pl.num_programs(1) - 1)
        def _():
            res = acc_ref[...]
            if with_bias:
                res = res + bias_ref[...]
            o_ref[...] = res.astype(o_ref.dtype)

    return kernel


def _graph_convolution_impl(x, adj, weight, bias=None):
    """Pallas GCN layer: adj @ (x @ weight) + bias.

    x:      [N, F_in]   float32
    adj:    [N, N]      float32 dense adjacency (torch.spmm equivalent)
    weight: [F_in, F_out]
    bias:   [F_out] or None
    returns [N, F_out]  float32
    """
    n, f_in = x.shape
    f_out = weight.shape[1]
    assert weight.shape[0] == f_in
    assert adj.shape == (n, n)

    f_in_pad = _round_up(f_in, 128)
    f_out_pad = _round_up(f_out, 128)
    tm, tk = _pick_tiles(n, f_in_pad, f_out_pad)

    n_rows = _round_up(n, tm)   # adj rows / output rows (parallel axis)
    n_cols = _round_up(n, tk)   # adj cols / x rows      (reduction axis)

    # Zero padding keeps the math exact; padded rows/cols contribute nothing.
    adj_p = _pad2d(adj, n_rows, n_cols)
    x_p = _pad2d(x, n_cols, f_in_pad)
    w_p = _pad2d(weight, f_in_pad, f_out_pad)

    with_bias = bias is not None
    operands = [adj_p, x_p, w_p]
    in_specs = [
        pl.BlockSpec((tm, tk), lambda i, k: (i, k)),              # adj (read once)
        pl.BlockSpec((tk, f_in_pad), lambda i, k: (k, 0)),        # x k-slice
        pl.BlockSpec((f_in_pad, f_out_pad), lambda i, k: (0, 0)),  # full weight
    ]
    if with_bias:
        bias_p = _pad2d(bias.reshape(1, f_out).astype(jnp.float32), 1, f_out_pad)
        operands.append(bias_p)
        in_specs.append(pl.BlockSpec((1, f_out_pad), lambda i, k: (0, 0)))

    grid = (n_rows // tm, n_cols // tk)

    out_p = pl.pallas_call(
        _make_gcn_kernel(with_bias),
        out_shape=jax.ShapeDtypeStruct((n_rows, f_out_pad), jnp.float32),
        grid_spec=pltpu.PrefetchScalarGridSpec(
            num_scalar_prefetch=0,
            grid=grid,
            in_specs=in_specs,
            out_specs=pl.BlockSpec((tm, f_out_pad), lambda i, k: (i, 0)),
            scratch_shapes=[pltpu.VMEM((tm, f_out_pad), jnp.float32)],
        ),
        compiler_params=pltpu.CompilerParams(
            dimension_semantics=("parallel", "arbitrary"),
            vmem_limit_bytes=_vmem_limit_bytes(tm, tk, f_in_pad, f_out_pad),
        ),
    )(*operands)

    return out_p[:n, :f_out]


# Jitted entry point: pad/slice fuse around the pallas_call, no HBM temporaries
# beyond what padding requires.
graph_convolution = jax.jit(_graph_convolution_impl)


def init_params(key, in_features, out_features, bias=True):
    """Deterministic init matching reset_parameters(): U(-stdv, stdv)."""
    stdv = 1.0 / math.sqrt(out_features)
    kw, kb = jax.random.split(key)
    weight = jax.random.uniform(
        kw, (in_features, out_features), dtype=jnp.float32, minval=-stdv, maxval=stdv
    )
    b = None
    if bias:
        b = jax.random.uniform(
            kb, (out_features,), dtype=jnp.float32, minval=-stdv, maxval=stdv
        )
    return weight, b


if __name__ == "__main__":
    key = jax.random.PRNGKey(0)
    k_x, k_adj, k_p = jax.random.split(key, 3)

    N = 64          # number of graph nodes
    F_IN = 32       # in_features
    F_OUT = 16      # out_features

    x = jax.random.normal(k_x, (N, F_IN), dtype=jnp.float32)

    # Dense symmetric row-normalized adjacency (deterministic).
    a_raw = (jax.random.uniform(k_adj, (N, N)) < 0.1).astype(jnp.float32)
    a_sym = jnp.maximum(a_raw, a_raw.T) + jnp.eye(N, dtype=jnp.float32)
    adj = a_sym / jnp.sum(a_sym, axis=1, keepdims=True)

    weight, bias = init_params(k_p, F_IN, F_OUT, bias=True)

    out = graph_convolution(x, adj, weight, bias)
    out = jax.block_until_ready(out)

    # Reference check in plain JAX (f32).  Streams are cast to bf16 in-kernel
    # with f32 accumulation, so allow bf16-level tolerance.
    ref = adj @ (x @ weight) + bias[None, :]
    assert out.shape == (N, F_OUT)
    assert jnp.allclose(out, ref, atol=5e-2, rtol=5e-2)

    # Also exercise the bias-less kernel variant.
    out_nb = jax.block_until_ready(graph_convolution(x, adj, weight, None))
    ref_nb = adj @ (x @ weight)
    assert jnp.allclose(out_nb, ref_nb, atol=5e-2, rtol=5e-2)

    print("KERNEL_OK")
</pallas_src>

<mosaic_0001>
module attributes {stable_mosaic.version = 11 : i64} {
  func.func @kernel(%arg0: i32, %arg1: i32, %arg2: memref<128x128xf32, #tpu.memory_space<vmem>>, %arg3: memref<128x128xf32, #tpu.memory_space<vmem>>, %arg4: memref<128x128xf32, #tpu.memory_space<vmem>>, %arg5: memref<1x128xf32, #tpu.memory_space<vmem>>, %arg6: memref<128x128xf32, #tpu.memory_space<vmem>>, %arg7: memref<128x128xf32, #tpu.memory_space<vmem>>) attributes {dimension_semantics = [#tpu.dimension_semantics<parallel>, #tpu.dimension_semantics<arbitrary>], iteration_bounds = array<i64: 1, 1>, scalar_prefetch = 0 : i64, scratch_operands = 1 : i64, tpu.core_type = #tpu.core_type<tc>, window_params = [{transform_indices = @transform_0, window_bounds = array<i64: 128, 128>}, {transform_indices = @transform_1, window_bounds = array<i64: 128, 128>}, {pipeline_mode = #tpu.pipeline_mode<synchronous>, transform_indices = @transform_2, window_bounds = array<i64: 128, 128>}, {pipeline_mode = #tpu.pipeline_mode<synchronous>, transform_indices = @transform_3, window_bounds = array<i64: 1, 128>}, {transform_indices = @transform_4, window_bounds = array<i64: 128, 128>}]} {
    %c0_i32 = arith.constant 0 : i32
    %0 = arith.cmpi eq, %arg1, %c0_i32 : i32
    %1 = arith.extui %0 : i1 to i32
    %c0_i32_0 = arith.constant 0 : i32
    %2 = arith.cmpi ne, %1, %c0_i32_0 : i32
    scf.if %2 {
      %cst_13 = arith.constant 0.000000e+00 : f32
      %18 = vector.broadcast %cst_13 : f32 to vector<128x128xf32>
      %c0_14 = arith.constant 0 : index
      %c0_15 = arith.constant 0 : index
      %19 = vector.load %arg7[%c0_14, %c0_15] : memref<128x128xf32, #tpu.memory_space<vmem>>, vector<128x128xf32>
      tpu.vector_store %arg7[%c0_14, %c0_15], %18 {strides = array<i32>} : memref<128x128xf32, #tpu.memory_space<vmem>>, vector<128x128xf32>,
    } else {
    }
    %c0 = arith.constant 0 : index
    %c0_1 = arith.constant 0 : index
    %3 = vector.load %arg3[%c0, %c0_1] : memref<128x128xf32, #tpu.memory_space<vmem>>, vector<128x128xf32>
    %4 = arith.truncf %3 : vector<128x128xf32> to vector<128x128xbf16>
    %c0_2 = arith.constant 0 : index
    %c0_3 = arith.constant 0 : index
    %5 = vector.load %arg4[%c0_2, %c0_3] : memref<128x128xf32, #tpu.memory_space<vmem>>, vector<128x128xf32>
    %6 = arith.truncf %5 : vector<128x128xf32> to vector<128x128xbf16>
    %cst = arith.constant dense<0.000000e+00> : vector<128x128xf32>
    %7 = tpu.matmul %4, %6, %cst {dimension_numbers = #tpu.dot_dimension_numbers<[1], [0], [0], [1], [0, 0, 1, 1], [], []>} : vector<128x128xbf16>, vector<128x128xbf16>, vector<128x128xf32> -> vector<128x128xf32>
    %c0_4 = arith.constant 0 : index
    %c0_5 = arith.constant 0 : index
    %8 = vector.load %arg7[%c0_4, %c0_5] : memref<128x128xf32, #tpu.memory_space<vmem>>, vector<128x128xf32>
    %c0_6 = arith.constant 0 : index
    %c0_7 = arith.constant 0 : index
    %9 = vector.load %arg2[%c0_6, %c0_7] : memref<128x128xf32, #tpu.memory_space<vmem>>, vector<128x128xf32>
    %10 = arith.truncf %9 : vector<128x128xf32> to vector<128x128xbf16>
    %11 = arith.truncf %7 : vector<128x128xf32> to vector<128x128xbf16>
    %cst_8 = arith.constant dense<0.000000e+00> : vector<128x128xf32>
    %12 = tpu.matmul %10, %11, %cst_8 {dimension_numbers = #tpu.dot_dimension_numbers<[1], [0], [0], [1], [0, 0, 1, 1], [], []>} : vector<128x128xbf16>, vector<128x128xbf16>, vector<128x128xf32> -> vector<128x128xf32>
    %13 = arith.addf %8, %12 : vector<128x128xf32>
    %c0_9 = arith.constant 0 : index
    %c0_10 = arith.constant 0 : index
    %14 = vector.load %arg7[%c0_9, %c0_10] : memref<128x128xf32, #tpu.memory_space<vmem>>, vector<128x128xf32>
    tpu.vector_store %arg7[%c0_9, %c0_10], %13 {strides = array<i32>} : memref<128x128xf32, #tpu.memory_space<vmem>>, vector<128x128xf32>,
    %c0_i32_11 = arith.constant 0 : i32
    %15 = arith.cmpi eq, %arg1, %c0_i32_11 : i32
    %16 = arith.extui %15 : i1 to i32
    %c0_i32_12 = arith.constant 0 : i32
    %17 = arith.cmpi ne, %16, %c0_i32_12 : i32
    scf.if %17 {
      %c0_13 = arith.constant 0 : index
      %c0_14 = arith.constant 0 : index
      %18 = vector.load %arg7[%c0_13, %c0_14] : memref<128x128xf32, #tpu.memory_space<vmem>>, vector<128x128xf32>
      %c0_15 = arith.constant 0 : index
      %c0_16 = arith.constant 0 : index
      %19 = vector.load %arg5[%c0_15, %c0_16] : memref<1x128xf32, #tpu.memory_space<vmem>>, vector<1x128xf32>
      %20 = vector.broadcast %19 : vector<1x128xf32> to vector<128x128xf32>
      %21 = arith.addf %18, %20 : vector<128x128xf32>
      %c0_17 = arith.constant 0 : index
      %c0_18 = arith.constant 0 : index
      %22 = vector.load %arg6[%c0_17, %c0_18] : memref<128x128xf32, #tpu.memory_space<vmem>>, vector<128x128xf32>
      tpu.vector_store %arg6[%c0_17, %c0_18], %21 {strides = array<i32>} : memref<128x128xf32, #tpu.memory_space<vmem>>, vector<128x128xf32>,
    } else {
    }
    return
  }
  func.func @transform_0(%arg0: i32, %arg1: i32) -> (i32, i32) {
    %c0_i32 = arith.constant 0 : i32
    return %arg0, %arg1 : i32, i32
  }
  func.func @transform_1(%arg0: i32, %arg1: i32) -> (i32, i32) {
    %c0_i32 = arith.constant 0 : i32
    %c0_i32_0 = arith.constant 0 : i32
    return %arg1, %c0_i32 : i32, i32
  }
  func.func @transform_2(%arg0: i32, %arg1: i32) -> (i32, i32) {
    %c0_i32 = arith.constant 0 : i32
    %c0_i32_0 = arith.constant 0 : i32
    %c0_i32_1 = arith.constant 0 : i32
    return %c0_i32, %c0_i32_0 : i32, i32
  }
  func.func @transform_3(%arg0: i32, %arg1: i32) -> (i32, i32) {
    %c0_i32 = arith.constant 0 : i32
    %c0_i32_0 = arith.constant 0 : i32
    %c0_i32_1 = arith.constant 0 : i32
    return %c0_i32, %c0_i32_0 : i32, i32
  }
  func.func @transform_4(%arg0: i32, %arg1: i32) -> (i32, i32) {
    %c0_i32 = arith.constant 0 : i32
    %c0_i32_0 = arith.constant 0 : i32
    return %arg0, %c0_i32 : i32, i32
  }
}

</mosaic_0001>

<bundles_post_ra>
// kernel: _graph_convolution_impl.1
= control target key start
LH: loop header
LB: loop body
LE: loop exit
PB: predicated region body
PF: predicated region fallthrough
CT: control target
= control target key end

     0   :  { %s739_s2 = inlined_call_operand.vmem [shape: f32[128,128], index: 2, kind: input, shape index: {}]   ;;  %s740_s1 = inlined_call_operand.vmem [shape: f32[128,128], index: 1, kind: input, shape index: {}]   ;;  %s741_s0 = inlined_call_operand.vmem [shape: f32[128,128], index: 0, kind: input, shape index: {}]   ;;  %s742_s3 = inlined_call_operand.vmem [shape: f32[1,128], index: 3, kind: input, shape index: {}]   ;;  %s743_s4 = inlined_call_operand.vmem [shape: f32[128,128], index: 4, kind: output, shape index: {}]  }
   0x1   :  { %v62_v0 = vld [vmem:[%s739_s2] sm:$0xff]  ;;  %v63_v1 = vld [vmem:[%s739_s2 + $0x8] sm:$0xff]  ;;  %v64_v2 = vld [vmem:[%s739_s2 + $0x10] sm:$0xff] }
   0x2   :  { %v78_v3 = vpack.c.bf16 %v63_v1, %v62_v0  ;;  %v65_v4 = vld [vmem:[%s739_s2 + $0x18] sm:$0xff]  ;;  %v66_v6 = vld [vmem:[%s739_s2 + $0x20] sm:$0xff]  ;;  %v67_v7 = vld [vmem:[%s739_s2 + $0x28] sm:$0xff] }
   0x3   :  { %v79_v5 = vpack.c.bf16 %v65_v4, %v64_v2  ;;  %v80_v8 = vpack.c.bf16 %v67_v7, %v66_v6  ;;  %v38_v9 = vld [vmem:[%s740_s1] sm:$0xff]  ;;  %v39_v10 = vld [vmem:[%s740_s1 + $0x8] sm:$0xff]  ;;  %v68_v11 = vld [vmem:[%s739_s2 + $0x30] sm:$0xff] }
   0x4   :  { %455 = vmatprep.subr.bf16.mxu0 %v78_v3  ;;  %v69_v12 = vld [vmem:[%s739_s2 + $0x38] sm:$0xff]  ;;  %v54_v13 = vpack.c.bf16 %v39_v10, %v38_v9  ;;  %v70_v15 = vld [vmem:[%s739_s2 + $0x40] sm:$0xff]  ;;  %v71_v16 = vld [vmem:[%s739_s2 + $0x48] sm:$0xff] }
   0x5   :  { %456 = vmatpush3.bf16.msra.mxu0 %v78_v3  ;;  %v81_v14 = vpack.c.bf16 %v69_v12, %v68_v11  ;;  %v82_v17 = vpack.c.bf16 %v71_v16, %v70_v15  ;;  %v72_v18 = vld [vmem:[%s739_s2 + $0x50] sm:$0xff]  ;;  %v73_v19 = vld [vmem:[%s739_s2 + $0x58] sm:$0xff]  ;;  %v74_v21 = vld [vmem:[%s739_s2 + $0x60] sm:$0xff] }
   0x6   :  { %457 = vmatprep.subr.bf16.mxu0 %v79_v5  ;;  %471 = vmatprep.mubr.bf16.mxu0 %v54_v13  ;;  %v83_v20 = vpack.c.bf16 %v73_v19, %v72_v18  ;;  %v75_v22 = vld [vmem:[%s739_s2 + $0x68] sm:$0xff]  ;;  %v76_v24 = vld [vmem:[%s739_s2 + $0x70] sm:$0xff]  ;;  %v77_v25 = vld [vmem:[%s739_s2 + $0x78] sm:$0xff] }
   0x7   :  { %v84_v23 = vpack.c.bf16 %v75_v22, %v74_v21  ;;  %v85_v26 = vpack.c.bf16 %v77_v25, %v76_v24  ;;  %v40_v27 = vld [vmem:[%s740_s1 + $0x10] sm:$0xff]  ;;  %v41_v28 = vld [vmem:[%s740_s1 + $0x18] sm:$0xff]  ;;  %v42_v29 = vld [vmem:[%s740_s1 + $0x20] sm:$0xff] }
   0x8   :  { %v43_v30 = vld [vmem:[%s740_s1 + $0x28] sm:$0xff]  ;;  %v55_v31 = vpack.c.bf16 %v41_v28, %v40_v27  ;;  %v44_v33 = vld [vmem:[%s740_s1 + $0x30] sm:$0xff]  ;;  %v45_v34 = vld [vmem:[%s740_s1 + $0x38] sm:$0xff] }
   0x9   :  { %458 = vmatpush3.bf16.msra.mxu0 %v79_v5  ;;  %v56_v32 = vpack.c.bf16 %v43_v30, %v42_v29  ;;  %v46_v35 = vld [vmem:[%s740_s1 + $0x40] sm:$0xff]  ;;  %v47_v36 = vld [vmem:[%s740_s1 + $0x48] sm:$0xff]  ;;  %v57_v37 = vpack.c.bf16 %v45_v34, %v44_v33  ;;  %v48_v39 = vld [vmem:[%s740_s1 + $0x50] sm:$0xff] }
   0xa   :  { %459 = vmatprep.subr.bf16.mxu0 %v80_v8  ;;  %v58_v38 = vpack.c.bf16 %v47_v36, %v46_v35  ;;  %v49_v40 = vld [vmem:[%s740_s1 + $0x58] sm:$0xff]  ;;  %v50_v41 = vld [vmem:[%s740_s1 + $0x60] sm:$0xff]  ;;  %v51_v42 = vld [vmem:[%s740_s1 + $0x68] sm:$0xff] }
   0xb   :  { %v59_v43 = vpack.c.bf16 %v49_v40, %v48_v39  ;;  %v60_v44 = vpack.c.bf16 %v51_v42, %v50_v41  ;;  %v52_v45 = vld [vmem:[%s740_s1 + $0x70] sm:$0xff]  ;;  %v53_v46 = vld [vmem:[%s740_s1 + $0x78] sm:$0xff]  ;;  %v199_v48 = vld [vmem:[%s741_s0] sm:$0xff] }
   0xc   :  { %v61_v47 = vpack.c.bf16 %v53_v46, %v52_v45  ;;  %v200_v49 = vld [vmem:[%s741_s0 + $0x8] sm:$0xff]  ;;  %v201_v11 = vld [vmem:[%s741_s0 + $0x10] sm:$0xff]  ;;  %v202_v12 = vld [vmem:[%s741_s0 + $0x18] sm:$0xff] }
   0xd   :  { %460 = vmatpush3.bf16.msra.mxu0 %v80_v8  ;;  %v215_v50 = vpack.c.bf16 %v200_v49, %v199_v48  ;;  %v203_v13 = vld [vmem:[%s741_s0 + $0x20] sm:$0xff]  ;;  %v216_v15 = vpack.c.bf16 %v202_v12, %v201_v11  ;;  %v206_v18 = vld [vmem:[%s741_s0 + $0x38] sm:$0xff]  ;;  %v213_v29 = vld [vmem:[%s741_s0 + $0x70] sm:$0xff] }
   0xe   :  { %461 = vmatprep.subr.bf16.mxu0 %v81_v14  ;;  %v207_v19 = vld [vmem:[%s741_s0 + $0x40] sm:$0xff]  ;;  %v210_v24 = vld [vmem:[%s741_s0 + $0x58] sm:$0xff] }
   0xf   :  { %503 = vmatprep.mubr.bf16.mxu1 %v215_v50  ;;  %v211_v25 = vld [vmem:[%s741_s0 + $0x60] sm:$0xff]  ;;  %v214_v30 = vld [vmem:[%s741_s0 + $0x78] sm:$0xff] }
  0x11   :  { %462 = vmatpush3.bf16.msra.mxu0 %v81_v14  ;;  %v204_v14 = vld [vmem:[%s741_s0 + $0x28] sm:$0xff] }
  0x12   :  { %463 = vmatprep.subr.bf16.mxu0 %v82_v17  ;;  %v217_v16 = vpack.c.bf16 %v204_v14, %v203_v13 }
  0x15   :  { %464 = vmatpush3.bf16.msra.mxu0 %v82_v17  ;;  %v205_v17 = vld [vmem:[%s741_s0 + $0x30] sm:$0xff] }
  0x16   :  { %465 = vmatprep.subr.bf16.mxu0 %v83_v20  ;;  %v218_v21 = vpack.c.bf16 %v206_v18, %v205_v17 }
  0x19   :  { %466 = vmatpush3.bf16.msra.mxu0 %v83_v20  ;;  %v208_v20 = vld [vmem:[%s741_s0 + $0x48] sm:$0xff] }
  0x1a   :  { %467 = vmatprep.subr.bf16.mxu0 %v84_v23  ;;  %v219_v22 = vpack.c.bf16 %v208_v20, %v207_v19 }
  0x1d   :  { %468 = vmatpush3.bf16.msra.mxu0 %v84_v23  ;;  %v209_v23 = vld [vmem:[%s741_s0 + $0x50] sm:$0xff] }
  0x1e   :  { %469 = vmatprep.subr.bf16.mxu0 %v85_v26  ;;  %v220_v27 = vpack.c.bf16 %v210_v24, %v209_v23 }
  0x21   :  { %470 = vmatpush3.bf16.msra.mxu0 %v85_v26  ;;  %v212_v26 = vld [vmem:[%s741_s0 + $0x68] sm:$0xff] }
  0x22   :  { %v221_v28 = vpack.c.bf16 %v212_v26, %v211_v25 }
  0x24   :  { %472 = vmatmul.mubr.bf16.vlgmr.msra.gmra.mrb[0].mxu0 %v55_v31  ;;  %v222_v31 = vpack.c.bf16 %v214_v30, %v213_v29 }
  0x25   :  { %475 = vmatprep.mubr.bf16.mxu0 %v56_v32  ;;  %v422_v32 = vld [vmem:[%s742_s3] ss:$0 sm:$0xff] }
  0x2c   :  { %476 = vmatmul.mubr.bf16.gmra.mrb[4].mxu0 %v57_v37 }
  0x2d   :  { %479 = vmatprep.mubr.bf16.mxu0 %v58_v38 }
  0x34   :  { %480 = vmatmul.mubr.bf16.gmra.mrb[8].mxu0 %v59_v43 }
  0x35   :  { %483 = vmatprep.mubr.bf16.mxu0 %v60_v44 }
  0x3c   :  { %484 = vmatmul.mubr.bf16.gmra.mrb[12].mxu0 %v61_v47 }
  0xf7   :  { %v473_v51 = vpop.f32.mrb[0].mxu0 }
  0xf8   :  { %v120_v52 = vpop.f32.mrb[1].mxu0 }
  0xf9   :  { %v474_v53 = vpop.f32.mrb[2].mxu0 }
  0xfa   :  { %v224_v54 = vpack.c.bf16 %v474_v53, %v473_v51  ;;  %v123_v55 = vpop.f32.mrb[3].mxu0 }
  0xfb   :  { %v223_v56 = vpack.c.bf16 %v123_v55, %v120_v52 }
  0xfd   :  { %487 = vmatprep.subr.bf16.mxu1 %v223_v56 }
  0xfe   :  { %488 = vmatpush3.bf16.msra.mxu1 %v223_v56 }
  0xff   :  { %v477_v57 = vpop.f32.mrb[4].mxu0  ;;  %489 = vmatprep.subr.bf16.mxu1 %v224_v54 }
 0x100   :  { %v136_v58 = vpop.f32.mrb[5].mxu0 }
 0x101   :  { %v478_v59 = vpop.f32.mrb[6].mxu0 }
 0x102   :  { %v226_v60 = vpack.c.bf16 %v478_v59, %v477_v57  ;;  %v139_v61 = vpop.f32.mrb[7].mxu0  ;;  %490 = vmatpush3.bf16.msra.mxu1 %v224_v54 }
 0x103   :  { %v225_v62 = vpack.c.bf16 %v139_v61, %v136_v58 }
 0x105   :  { %491 = vmatprep.subr.bf16.mxu1 %v225_v62 }
 0x106   :  { %492 = vmatpush3.bf16.msra.mxu1 %v225_v62 }
 0x107   :  { %v481_v63 = vpop.f32.mrb[8].mxu0  ;;  %493 = vmatprep.subr.bf16.mxu1 %v226_v60 }
 0x108   :  { %v152_v0 = vpop.f32.mrb[9].mxu0 }
 0x109   :  { %v482_v1 = vpop.f32.mrb[10].mxu0 }
 0x10a   :  { %v228_v2 = vpack.c.bf16 %v482_v1, %v481_v63  ;;  %v155_v3 = vpop.f32.mrb[11].mxu0  ;;  %494 = vmatpush3.bf16.msra.mxu1 %v226_v60 }
 0x10b   :  { %v227_v4 = vpack.c.bf16 %v155_v3, %v152_v0 }
 0x10d   :  { %495 = vmatprep.subr.bf16.mxu1 %v227_v4 }
 0x10e   :  { %496 = vmatpush3.bf16.msra.mxu1 %v227_v4 }
 0x10f   :  { %v485_v5 = vpop.f32.mrb[12].mxu0  ;;  %497 = vmatprep.subr.bf16.mxu1 %v228_v2 }
 0x110   :  { %v168_v6 = vpop.f32.mrb[13].mxu0 }
 0x111   :  { %v486_v7 = vpop.f32.mrb[14].mxu0 }
 0x112   :  { %v230_v8 = vpack.c.bf16 %v486_v7, %v485_v5  ;;  %v171_v9 = vpop.f32.mrb[15].mxu0  ;;  %498 = vmatpush3.bf16.msra.mxu1 %v228_v2 }
 0x113   :  { %v229_v10 = vpack.c.bf16 %v171_v9, %v168_v6 }
 0x115   :  { %499 = vmatprep.subr.bf16.mxu1 %v229_v10 }
 0x116   :  { %500 = vmatpush3.bf16.msra.mxu1 %v229_v10 }
 0x117   :  { %501 = vmatprep.subr.bf16.mxu1 %v230_v8 }
 0x11a   :  { %502 = vmatpush3.bf16.msra.mxu1 %v230_v8 }
 0x11d   :  { %504 = vmatmul.mubr.bf16.vlgmr.msra.gmra.mrb[0].mxu1 %v216_v15 }
 0x11e   :  { %507 = vmatprep.mubr.bf16.mxu1 %v217_v16 }
 0x125   :  { %508 = vmatmul.mubr.bf16.gmra.mrb[4].mxu1 %v218_v21 }
 0x126   :  { %511 = vmatprep.mubr.bf16.mxu1 %v219_v22 }
 0x12d   :  { %512 = vmatmul.mubr.bf16.gmra.mrb[8].mxu1 %v220_v27 }
 0x12e   :  { %515 = vmatprep.mubr.bf16.mxu1 %v221_v28 }
 0x135   :  { %516 = vmatmul.mubr.bf16.gmra.mrb[12].mxu1 %v222_v31 }
 0x1f0   :  { %v505_v33 = vpop.f32.mrb[0].mxu1 }
 0x1f1   :  { %v388_v34 = vadd.f32 %v505_v33, %v422_v32  ;;  %v265_v35 = vpop.f32.mrb[1].mxu1 }
 0x1f2   :  { %v386_v36 = vadd.f32 %v422_v32, %v265_v35  ;;  %v506_v37 = vpop.f32.mrb[2].mxu1 }
 0x1f3   :  { %404 = vst [vmem:[%s743_s4 + $0x10] sm:$0xff] %v388_v34  ;;  %v389_v38 = vadd.f32 %v506_v37, %v422_v32  ;;  %v268_v39 = vpop.f32.mrb[3].mxu1 }
 0x1f4   :  { %402 = vst [vmem:[%s743_s4] sm:$0xff] %v386_v36  ;;  %v387_v40 = vadd.f32 %v422_v32, %v268_v39 }
 0x1f5   :  { %405 = vst [vmem:[%s743_s4 + $0x18] sm:$0xff] %v389_v38 }
 0x1f6   :  { %403 = vst [vmem:[%s743_s4 + $0x8] sm:$0xff] %v387_v40 }
 0x1f8   :  { %v509_v41 = vpop.f32.mrb[4].mxu1 }
 0x1f9   :  { %v392_v42 = vadd.f32 %v509_v41, %v422_v32  ;;  %v281_v43 = vpop.f32.mrb[5].mxu1 }
 0x1fa   :  { %v390_v44 = vadd.f32 %v422_v32, %v281_v43  ;;  %v510_v45 = vpop.f32.mrb[6].mxu1 }
 0x1fb   :  { %408 = vst [vmem:[%s743_s4 + $0x30] sm:$0xff] %v392_v42  ;;  %v393_v46 = vadd.f32 %v510_v45, %v422_v32  ;;  %v284_v47 = vpop.f32.mrb[7].mxu1 }
 0x1fc   :  { %406 = vst [vmem:[%s743_s4 + $0x20] sm:$0xff] %v390_v44  ;;  %v391_v48 = vadd.f32 %v422_v32, %v284_v47 }
 0x1fd   :  { %409 = vst [vmem:[%s743_s4 + $0x38] sm:$0xff] %v393_v46 }
 0x1fe   :  { %407 = vst [vmem:[%s743_s4 + $0x28] sm:$0xff] %v391_v48 }
 0x200   :  { %v513_v49 = vpop.f32.mrb[8].mxu1 }
 0x201   :  { %v396_v50 = vadd.f32 %v513_v49, %v422_v32  ;;  %v297_v51 = vpop.f32.mrb[9].mxu1 }
 0x202   :  { %v394_v52 = vadd.f32 %v422_v32, %v297_v51  ;;  %v514_v53 = vpop.f32.mrb[10].mxu1 }
 0x203   :  { %412 = vst [vmem:[%s743_s4 + $0x50] sm:$0xff] %v396_v50  ;;  %v397_v54 = vadd.f32 %v514_v53, %v422_v32  ;;  %v300_v55 = vpop.f32.mrb[11].mxu1 }
 0x204   :  { %410 = vst [vmem:[%s743_s4 + $0x40] sm:$0xff] %v394_v52  ;;  %v395_v56 = vadd.f32 %v422_v32, %v300_v55 }
 0x205   :  { %413 = vst [vmem:[%s743_s4 + $0x58] sm:$0xff] %v397_v54 }
 0x206   :  { %411 = vst [vmem:[%s743_s4 + $0x48] sm:$0xff] %v395_v56 }
 0x208   :  { %v517_v57 = vpop.f32.mrb[12].mxu1 }
 0x209   :  { %v400_v58 = vadd.f32 %v517_v57, %v422_v32  ;;  %v313_v59 = vpop.f32.mrb[13].mxu1 }
 0x20a   :  { %v398_v60 = vadd.f32 %v422_v32, %v313_v59  ;;  %v518_v61 = vpop.f32.mrb[14].mxu1 }
 0x20b   :  { %416 = vst [vmem:[%s743_s4 + $0x70] sm:$0xff] %v400_v58  ;;  %v401_v62 = vadd.f32 %v518_v61, %v422_v32  ;;  %v316_v63 = vpop.f32.mrb[15].mxu1 }
 0x20c   :  { %414 = vst [vmem:[%s743_s4 + $0x60] sm:$0xff] %v398_v60  ;;  %v399_v0 = vadd.f32 %v422_v32, %v316_v63 }
 0x20d   :  { %417 = vst [vmem:[%s743_s4 + $0x78] sm:$0xff] %v401_v62 }
 0x20e   :  { %415 = vst [vmem:[%s743_s4 + $0x68] sm:$0xff] %v399_v0 }

</bundles_post_ra>
